<compile_context>
chip_gen: v7x
topology: tpu7x:2x2x1
jax: 0.10.0
libtpu: 0.0.40
codegen_flags: <defaults>
</compile_context>

<pallas_src>
import math

import jax
import jax.numpy as jnp
from jax.experimental import pallas as pl
from jax.experimental.pallas import tpu as pltpu


def _round_up(x, m):
    return ((x + m - 1) // m) * m


def _cdiv(a, b):
    return -(-a // b)


def _color_mlp_kernel(feat_ref, dirs_ref, w1a_ref, w1b_ref, b1_ref,
                      w2_ref, b2_ref, w3_ref, b3_ref, o_ref):
    # ---- Layer 1 (transposed orientation, fused "concat" as two matmuls) ----
    # dot_general contracts dim 1 of the (out, in) weight with dim 1 of the
    # (tile, in) activation block -> (out, tile); the tile dim stays on the
    # lane axis so the MXU result width is full.  f32 accumulation on the MXU.
    h1 = jax.lax.dot_general(
        w1a_ref[...], feat_ref[...],
        dimension_numbers=(((1,), (1,)), ((), ())),
        preferred_element_type=jnp.float32)
    h1 = h1 + jax.lax.dot_general(
        w1b_ref[...], dirs_ref[...],
        dimension_numbers=(((1,), (1,)), ((), ())),
        preferred_element_type=jnp.float32)
    # Bias + ReLU in the elementwise dtype carried by the bias (bf16 on
    # v6e/v7x, f32 if the caller asked for it), then cast for the next matmul.
    h1 = jnp.maximum(h1.astype(b1_ref.dtype) + b1_ref[...], 0)
    h1 = h1.astype(w2_ref.dtype)                              # (h1, tile)

    # ---- Layer 2: (h2, h1) @ (h1, tile) -> (h2, tile), lane-dense ----
    h2 = jnp.dot(w2_ref[...], h1, preferred_element_type=jnp.float32)
    h2 = jnp.maximum(h2.astype(b2_ref.dtype) + b2_ref[...], 0)
    h2 = h2.astype(w3_ref.dtype)                              # (h2, tile)

    # ---- Layer 3 + sigmoid: (3, h2) @ (h2, tile) -> (3, tile), f32 sigmoid --
    logits = jnp.dot(w3_ref[...], h2, preferred_element_type=jnp.float32)
    o_ref[...] = jax.nn.sigmoid(logits + b3_ref[...]).astype(o_ref.dtype)


def prepare_color_mlp_params(params, feature_dim, *,
                             compute_dtype=jnp.bfloat16,
                             elementwise_dtype=jnp.bfloat16):
    """One-time weight preprocessing (hoist out of the hot path).

    params: (w1, b1, w2, b2, w3, b3) with weights stored (in, out).
    Returns weights transposed to (out, in), W1 split into feature/dir parts,
    matmul operands cast to compute_dtype, biases as columns.
    """
    w1, b1, w2, b2, w3, b3 = params
    w1a_t = w1[:feature_dim].T.astype(compute_dtype)      # (h1, feature_dim)
    w1b_t = w1[feature_dim:].T.astype(compute_dtype)      # (h1, dir_dim)
    w2_t = w2.T.astype(compute_dtype)                     # (h2, h1)
    w3_t = w3.T.astype(compute_dtype)                     # (3,  h2)
    b1c = b1.reshape(-1, 1).astype(elementwise_dtype)     # (h1, 1)
    b2c = b2.reshape(-1, 1).astype(elementwise_dtype)     # (h2, 1)
    b3c = b3.reshape(-1, 1).astype(jnp.float32)           # (3, 1)  f32 sigmoid path
    return (w1a_t, w1b_t, b1c, w2_t, b2c, w3_t, b3c)


def color_mlp_pallas(features, view_dirs, params=None, *, prepared_params=None,
                     tile_n=8192, compute_dtype=jnp.bfloat16,
                     elementwise_dtype=jnp.bfloat16,
                     channel_major_output=False):
    """features: [N, feature_dim], view_dirs: [N, dir_dim] -> [N, 3].

    For repeated inference, call prepare_color_mlp_params() once and pass the
    result via prepared_params= to skip per-call weight preprocessing.
    On v5e pass elementwise_dtype=jnp.float32 (no bf16 VPU/EUP there).
    If channel_major_output=True, returns [3, N] and skips the final transpose.
    """
    if prepared_params is None:
        if params is None:
            raise ValueError("pass either params or prepared_params")
        prepared_params = prepare_color_mlp_params(
            params, features.shape[1], compute_dtype=compute_dtype,
            elementwise_dtype=elementwise_dtype)
    w1a_t, w1b_t, b1c, w2_t, b2c, w3_t, b3c = prepared_params

    n, feature_dim = features.shape
    dir_dim = view_dirs.shape[1]
    h1_dim = w2_t.shape[1]
    h2_dim = w2_t.shape[0]
    d_out = w3_t.shape[0]
    matmul_dtype = w1a_t.dtype
    out_dtype = features.dtype

    feat_c = features.astype(matmul_dtype)
    dirs_c = view_dirs.astype(matmul_dtype)

    # Tile selection: as large as requested (VMEM is plentiful for this kernel),
    # but capped so large inputs get >= 2 grid steps (keeps both v7x TCs busy
    # and gives the input pipeline something to overlap with).
    tile_req = max(128, _round_up(min(tile_n, max(n, 1)), 128))
    two_step_cap = max(128, _round_up(_cdiv(n, 2), 128))
    tile = min(tile_req, two_step_cap)
    n_pad = _round_up(n, tile)
    if n_pad != n:
        feat_c = jnp.pad(feat_c, ((0, n_pad - n), (0, 0)))
        dirs_c = jnp.pad(dirs_c, ((0, n_pad - n), (0, 0)))
    grid = (n_pad // tile,)

    weights = (w1a_t, w1b_t, b1c, w2_t, b2c, w3_t, b3c)
    flops = 2 * n_pad * (feature_dim * h1_dim + dir_dim * h1_dim
                         + h1_dim * h2_dim + h2_dim * d_out)
    bytes_accessed = int(
        feat_c.size * feat_c.dtype.itemsize
        + dirs_c.size * dirs_c.dtype.itemsize
        + sum(int(a.size) * a.dtype.itemsize for a in weights)
        + n_pad * d_out * jnp.dtype(out_dtype).itemsize)

    out_t = pl.pallas_call(
        _color_mlp_kernel,
        out_shape=jax.ShapeDtypeStruct((d_out, n_pad), out_dtype),
        grid_spec=pltpu.PrefetchScalarGridSpec(
            num_scalar_prefetch=0,
            grid=grid,
            in_specs=[
                pl.BlockSpec((tile, feature_dim), lambda i: (i, 0)),   # features
                pl.BlockSpec((tile, dir_dim), lambda i: (i, 0)),       # view_dirs
                pl.BlockSpec((h1_dim, feature_dim), lambda i: (0, 0)), # W1a^T
                pl.BlockSpec((h1_dim, dir_dim), lambda i: (0, 0)),     # W1b^T
                pl.BlockSpec((h1_dim, 1), lambda i: (0, 0)),           # b1
                pl.BlockSpec((h2_dim, h1_dim), lambda i: (0, 0)),      # W2^T
                pl.BlockSpec((h2_dim, 1), lambda i: (0, 0)),           # b2
                pl.BlockSpec((d_out, h2_dim), lambda i: (0, 0)),       # W3^T
                pl.BlockSpec((d_out, 1), lambda i: (0, 0)),            # b3
            ],
            out_specs=pl.BlockSpec((d_out, tile), lambda i: (0, i)),
        ),
        compiler_params=pltpu.CompilerParams(
            dimension_semantics=("parallel",),
            vmem_limit_bytes=48 * 1024 * 1024),
        cost_estimate=pl.CostEstimate(
            flops=flops,
            transcendentals=n_pad * d_out,
            bytes_accessed=bytes_accessed),
    )(feat_c, dirs_c, *weights)

    out = out_t[:, :n]                       # drop padded columns (tiny slab)
    if channel_major_output:
        return out                           # [3, N]
    return out.T                             # [N, 3] — matches PyTorch contract


def init_color_mlp_params(key, feature_dim, dir_dim, hidden_dim=128):
    """Deterministic init mimicking nn.Linear's kaiming-uniform fan-in init.

    Weights returned as (in_features, out_features)."""
    d_in = feature_dim + dir_dim
    dims = [(d_in, hidden_dim), (hidden_dim, hidden_dim // 2),
            (hidden_dim // 2, 3)]
    params = []
    for fan_in, fan_out in dims:
        key, kw, kb = jax.random.split(key, 3)
        bound = 1.0 / math.sqrt(fan_in)
        w = jax.random.uniform(kw, (fan_in, fan_out), jnp.float32, -bound, bound)
        b = jax.random.uniform(kb, (fan_out,), jnp.float32, -bound, bound)
        params += [w, b]
    return tuple(params)


def color_mlp_ref(features, view_dirs, params):
    """Pure-JAX f32 reference for correctness checking."""
    w1, b1, w2, b2, w3, b3 = params
    x = jnp.concatenate([features, view_dirs], axis=-1)
    h = jax.nn.relu(x @ w1 + b1)
    h = jax.nn.relu(h @ w2 + b2)
    return jax.nn.sigmoid(h @ w3 + b3)


if __name__ == "__main__":
    feature_dim, dir_dim, hidden_dim = 32, 16, 128
    n_points = 256  # small batch of ray samples

    key = jax.random.PRNGKey(0)
    k_feat, k_dir, k_params = jax.random.split(key, 3)
    features = jax.random.normal(k_feat, (n_points, feature_dim), jnp.float32)
    view_dirs = jax.random.normal(k_dir, (n_points, dir_dim), jnp.float32)
    view_dirs = view_dirs / jnp.linalg.norm(view_dirs, axis=-1, keepdims=True)

    params = init_color_mlp_params(k_params, feature_dim, dir_dim, hidden_dim)

    # Hoisted one-time weight preprocessing (per review), then the kernel call.
    prepared = prepare_color_mlp_params(params, feature_dim)
    out = color_mlp_pallas(features, view_dirs, prepared_params=prepared)
    out = jax.block_until_ready(out)

    ref = color_mlp_ref(features, view_dirs, params)
    assert out.shape == (n_points, 3)
    max_err = float(jnp.max(jnp.abs(out - ref)))
    # bf16 matmul operands / bf16 bias+ReLU with f32 accumulation + f32 sigmoid.
    assert max_err < 2e-2, f"mismatch vs reference, max_err={max_err}"

    print("KERNEL_OK")
</pallas_src>

<mosaic_0001>
module attributes {stable_mosaic.version = 11 : i64} {
  func.func @_color_mlp_kernel(%arg0: i32, %arg1: memref<128x32xbf16, #tpu.memory_space<vmem>>, %arg2: memref<128x16xbf16, #tpu.memory_space<vmem>>, %arg3: memref<128x32xbf16, #tpu.memory_space<vmem>>, %arg4: memref<128x16xbf16, #tpu.memory_space<vmem>>, %arg5: memref<128x1xbf16, #tpu.memory_space<vmem>>, %arg6: memref<64x128xbf16, #tpu.memory_space<vmem>>, %arg7: memref<64x1xbf16, #tpu.memory_space<vmem>>, %arg8: memref<3x64xbf16, #tpu.memory_space<vmem>>, %arg9: memref<3x1xf32, #tpu.memory_space<vmem>>, %arg10: memref<3x128xf32, #tpu.memory_space<vmem>>) attributes {dimension_semantics = [#tpu.dimension_semantics<parallel>], iteration_bounds = array<i64: 2>, scalar_prefetch = 0 : i64, scratch_operands = 0 : i64, tpu.core_type = #tpu.core_type<tc>, window_params = [{transform_indices = @transform_0, window_bounds = array<i64: 128, 32>}, {transform_indices = @transform_1, window_bounds = array<i64: 128, 16>}, {pipeline_mode = #tpu.pipeline_mode<synchronous>, transform_indices = @transform_2, window_bounds = array<i64: 128, 32>}, {pipeline_mode = #tpu.pipeline_mode<synchronous>, transform_indices = @transform_3, window_bounds = array<i64: 128, 16>}, {pipeline_mode = #tpu.pipeline_mode<synchronous>, transform_indices = @transform_4, window_bounds = array<i64: 128, 1>}, {pipeline_mode = #tpu.pipeline_mode<synchronous>, transform_indices = @transform_5, window_bounds = array<i64: 64, 128>}, {pipeline_mode = #tpu.pipeline_mode<synchronous>, transform_indices = @transform_6, window_bounds = array<i64: 64, 1>}, {pipeline_mode = #tpu.pipeline_mode<synchronous>, transform_indices = @transform_7, window_bounds = array<i64: 3, 64>}, {pipeline_mode = #tpu.pipeline_mode<synchronous>, transform_indices = @transform_8, window_bounds = array<i64: 3, 1>}, {transform_indices = @transform_9, window_bounds = array<i64: 3, 128>}]} {
    %c0 = arith.constant 0 : index
    %c0_0 = arith.constant 0 : index
    %0 = vector.load %arg3[%c0, %c0_0] : memref<128x32xbf16, #tpu.memory_space<vmem>>, vector<128x32xbf16>
    %c0_1 = arith.constant 0 : index
    %c0_2 = arith.constant 0 : index
    %1 = vector.load %arg1[%c0_1, %c0_2] : memref<128x32xbf16, #tpu.memory_space<vmem>>, vector<128x32xbf16>
    %cst = arith.constant dense<0.000000e+00> : vector<128x128xf32>
    %2 = tpu.matmul %0, %1, %cst {dimension_numbers = #tpu.dot_dimension_numbers<[1], [1], [0], [0], [0, 0, 1, 0], [], []>} : vector<128x32xbf16>, vector<128x32xbf16>, vector<128x128xf32> -> vector<128x128xf32>
    %c0_3 = arith.constant 0 : index
    %c0_4 = arith.constant 0 : index
    %3 = vector.load %arg4[%c0_3, %c0_4] : memref<128x16xbf16, #tpu.memory_space<vmem>>, vector<128x16xbf16>
    %c0_5 = arith.constant 0 : index
    %c0_6 = arith.constant 0 : index
    %4 = vector.load %arg2[%c0_5, %c0_6] : memref<128x16xbf16, #tpu.memory_space<vmem>>, vector<128x16xbf16>
    %cst_7 = arith.constant dense<0.000000e+00> : vector<128x128xf32>
    %5 = tpu.matmul %3, %4, %cst_7 {dimension_numbers = #tpu.dot_dimension_numbers<[1], [1], [0], [0], [0, 0, 1, 0], [], []>} : vector<128x16xbf16>, vector<128x16xbf16>, vector<128x128xf32> -> vector<128x128xf32>
    %6 = arith.addf %2, %5 : vector<128x128xf32>
    %7 = arith.truncf %6 : vector<128x128xf32> to vector<128x128xbf16>
    %c0_8 = arith.constant 0 : index
    %c0_9 = arith.constant 0 : index
    %8 = vector.load %arg5[%c0_8, %c0_9] : memref<128x1xbf16, #tpu.memory_space<vmem>>, vector<128x1xbf16>
    %9 = vector.broadcast %8 : vector<128x1xbf16> to vector<128x128xbf16>
    %10 = arith.addf %7, %9 : vector<128x128xbf16>
    %cst_10 = arith.constant 0.000000e+00 : bf16
    %11 = vector.broadcast %cst_10 : bf16 to vector<128x128xbf16>
    %12 = arith.maximumf %10, %11 : vector<128x128xbf16>
    %c0_11 = arith.constant 0 : index
    %c0_12 = arith.constant 0 : index
    %13 = vector.load %arg6[%c0_11, %c0_12] : memref<64x128xbf16, #tpu.memory_space<vmem>>, vector<64x128xbf16>
    %cst_13 = arith.constant dense<0.000000e+00> : vector<64x128xf32>
    %14 = tpu.matmul %13, %12, %cst_13 {dimension_numbers = #tpu.dot_dimension_numbers<[1], [0], [0], [1], [0, 0, 1, 1], [], []>} : vector<64x128xbf16>, vector<128x128xbf16>, vector<64x128xf32> -> vector<64x128xf32>
    %15 = arith.truncf %14 : vector<64x128xf32> to vector<64x128xbf16>
    %c0_14 = arith.constant 0 : index
    %c0_15 = arith.constant 0 : index
    %16 = vector.load %arg7[%c0_14, %c0_15] : memref<64x1xbf16, #tpu.memory_space<vmem>>, vector<64x1xbf16>
    %17 = vector.broadcast %16 : vector<64x1xbf16> to vector<64x128xbf16>
    %18 = arith.addf %15, %17 : vector<64x128xbf16>
    %cst_16 = arith.constant 0.000000e+00 : bf16
    %19 = vector.broadcast %cst_16 : bf16 to vector<64x128xbf16>
    %20 = arith.maximumf %18, %19 : vector<64x128xbf16>
    %c0_17 = arith.constant 0 : index
    %c0_18 = arith.constant 0 : index
    %21 = vector.load %arg8[%c0_17, %c0_18] : memref<3x64xbf16, #tpu.memory_space<vmem>>, vector<3x64xbf16>
    %cst_19 = arith.constant dense<0.000000e+00> : vector<3x128xf32>
    %22 = tpu.matmul %21, %20, %cst_19 {dimension_numbers = #tpu.dot_dimension_numbers<[1], [0], [0], [1], [0, 0, 1, 1], [], []>} : vector<3x64xbf16>, vector<64x128xbf16>, vector<3x128xf32> -> vector<3x128xf32>
    %c0_20 = arith.constant 0 : index
    %c0_21 = arith.constant 0 : index
    %23 = vector.load %arg9[%c0_20, %c0_21] : memref<3x1xf32, #tpu.memory_space<vmem>>, vector<3x1xf32>
    %24 = vector.broadcast %23 : vector<3x1xf32> to vector<3x128xf32>
    %25 = arith.addf %22, %24 : vector<3x128xf32>
    %26 = arith.negf %25 : vector<3x128xf32>
    %27 = math.exp %26 : vector<3x128xf32>
    %cst_22 = arith.constant 1.000000e+00 : f32
    %28 = vector.broadcast %cst_22 : f32 to vector<3x128xf32>
    %29 = arith.addf %28, %27 : vector<3x128xf32>
    %30 = arith.divf %28, %29 : vector<3x128xf32>
    %c0_23 = arith.constant 0 : index
    %c0_24 = arith.constant 0 : index
    %31 = vector.load %arg10[%c0_23, %c0_24] : memref<3x128xf32, #tpu.memory_space<vmem>>, vector<3x128xf32>
    tpu.vector_store %arg10[%c0_23, %c0_24], %30 {strides = array<i32>} : memref<3x128xf32, #tpu.memory_space<vmem>>, vector<3x128xf32>,
    return
  }
  func.func @transform_0(%arg0: i32) -> (i32, i32) {
    %c0_i32 = arith.constant 0 : i32
    %c0_i32_0 = arith.constant 0 : i32
    return %arg0, %c0_i32 : i32, i32
  }
  func.func @transform_1(%arg0: i32) -> (i32, i32) {
    %c0_i32 = arith.constant 0 : i32
    %c0_i32_0 = arith.constant 0 : i32
    return %arg0, %c0_i32 : i32, i32
  }
  func.func @transform_2(%arg0: i32) -> (i32, i32) {
    %c0_i32 = arith.constant 0 : i32
    %c0_i32_0 = arith.constant 0 : i32
    %c0_i32_1 = arith.constant 0 : i32
    return %c0_i32, %c0_i32_0 : i32, i32
  }
  func.func @transform_3(%arg0: i32) -> (i32, i32) {
    %c0_i32 = arith.constant 0 : i32
    %c0_i32_0 = arith.constant 0 : i32
    %c0_i32_1 = arith.constant 0 : i32
    return %c0_i32, %c0_i32_0 : i32, i32
  }
  func.func @transform_4(%arg0: i32) -> (i32, i32) {
    %c0_i32 = arith.constant 0 : i32
    %c0_i32_0 = arith.constant 0 : i32
    %c0_i32_1 = arith.constant 0 : i32
    return %c0_i32, %c0_i32_0 : i32, i32
  }
  func.func @transform_5(%arg0: i32) -> (i32, i32) {
    %c0_i32 = arith.constant 0 : i32
    %c0_i32_0 = arith.constant 0 : i32
    %c0_i32_1 = arith.constant 0 : i32
    return %c0_i32, %c0_i32_0 : i32, i32
  }
  func.func @transform_6(%arg0: i32) -> (i32, i32) {
    %c0_i32 = arith.constant 0 : i32
    %c0_i32_0 = arith.constant 0 : i32
    %c0_i32_1 = arith.constant 0 : i32
    return %c0_i32, %c0_i32_0 : i32, i32
  }
  func.func @transform_7(%arg0: i32) -> (i32, i32) {
    %c0_i32 = arith.constant 0 : i32
    %c0_i32_0 = arith.constant 0 : i32
    %c0_i32_1 = arith.constant 0 : i32
    return %c0_i32, %c0_i32_0 : i32, i32
  }
  func.func @transform_8(%arg0: i32) -> (i32, i32) {
    %c0_i32 = arith.constant 0 : i32
    %c0_i32_0 = arith.constant 0 : i32
    %c0_i32_1 = arith.constant 0 : i32
    return %c0_i32, %c0_i32_0 : i32, i32
  }
  func.func @transform_9(%arg0: i32) -> (i32, i32) {
    %c0_i32 = arith.constant 0 : i32
    %c0_i32_0 = arith.constant 0 : i32
    return %c0_i32, %arg0 : i32, i32
  }
}

</mosaic_0001>

<bundles_post_ra>
// kernel: tpu_custom_call.1
= control target key start
LH: loop header
LB: loop body
LE: loop exit
PB: predicated region body
PF: predicated region fallthrough
CT: control target
= control target key end

     0   :  { %14 = vsyncpa [#allocation3], 0  ;;  %s2350_s0 = inlined_call_operand.vmem [shape: bf16[256,32], index: 0, kind: input, shape index: {}]   ;;  %s2351_s1 = inlined_call_operand.vmem [shape: bf16[256,16], index: 1, kind: input, shape index: {}]   ;;  %s2352_s2 = inlined_call_operand.vmem [shape: bf16[128,32], index: 2, kind: input, shape index: {}]   ;;  %s2353_s3 = inlined_call_operand.vmem [shape: bf16[128,16], index: 3, kind: input, shape index: {}]   ;;  %s2354_s4 = inlined_call_operand.vmem [shape: bf16[128,1], index: 4, kind: input, shape index: {}]   ;;  %s2355_s5 = inlined_call_operand.vmem [shape: bf16[64,128], index: 5, kind: input, shape index: {}]   ;;  %s2356_s6 = inlined_call_operand.vmem [shape: bf16[64,1], index: 6, kind: input, shape index: {}]   ;;  %s2357_s7 = inlined_call_operand.vmem [shape: bf16[3,64], index: 7, kind: input, shape index: {}]   ;;  %s2358_s8 = inlined_call_operand.vmem [shape: f32[3,1], index: 8, kind: input, shape index: {}]   ;;  %s2359_s9 = inlined_call_operand.hbm [shape: f32[3,256], index: 9, kind: output, shape index: {}]  }
   0x1   :  { %16 = vsyncpa [#allocation3 + $0x1], 0  ;;  %s1996_s30 = smov 0   ;;  %s1998_s10 = smov 0  }
   0x2   :  { %s2000_s11 = smov 0   ;;  %s2002_s12 = smov 0  }
   0x3 LB: > { %s2017_s13 = sadd.s32 4294967295, %s1939_s12   ;;  %s1532_s14 = sadd.s32 4294967294, %s1939_s12   ;;  %s1939_s12 = sphi %s2002_s12, %s2365_s12   ;;  %s1935_s11 = sphi %s2000_s11, %s2364_s11   ;;  %s1931_s10 = sphi %s1998_s10, %s2363_s10   ;;  %s1927_s30 = sphi %s1996_s30, %s2362_s30  }
   0x4   : > { %s2021_s15 = sadd.s32 1, %s1939_s12   ;;  %s228_s16 = sadd.s32 1, %s1935_s11 }
   0x5   : > { %s225_s17 = ssub.s32 %s1939_s12, %s2021_s15  ;;  %p238_p0 = scmp.ne.s32.totalorder %s1935_s11, %s1931_s10 }
   0x6   : > { %p226_p1 = scmp.eq.s32.totalorder %s225_s17, 0  ;;  %p239_p2 = scmp.eq.s32.totalorder %s2017_s13, 1 }
   0x7   : > { %p244_p3 = scmp.ne.s32.totalorder %s1931_s10, %s1927_s30  ;;  %p245_p4 = scmp.eq.s32.totalorder %s1532_s14, 1 }
   0x8   : > { %s2032_s18 = scalar_select %p226_p1, %s1935_s11, %s228_s16  }
   0x9   : > { %p2034_p5 = por %p239_p2, %p238_p0  ;;  %p2038_p6 = por %p245_p4, %p244_p3 }
   0xa   : > { %p1535_p7 = scmp.ge.s32.totalorder %s1939_s12, 1  ;;  %p302_p8 = scmp.lt.s32.totalorder %s1939_s12, 3 }
   0xc   : > { %p303_p9 = pnand %p1535_p7, %p302_p8 }
   0xd   : > { %s1537_s21 = sshll.u32 (!%p303_p9), %s2017_s13, 4  ;;  %vm500_vm0 = vcmask (!%p303_p9), 130048   ;;  %vm726_vm1 = vcmask (!%p303_p9), 261120   ;;  %v1853_v0 = vld [vmem:[%s2353_s3] sm:$0xff] (!%p303_p9)   ;;  %v1941_v2 = vmov (!%p303_p9), 0   ;;  %v1855_v55 = vld [vmem:[%s2353_s3 + $0x8] sm:$0xff] (!%p303_p9)  }
   0xe   : > { %306 = sbr.rel (%p303_p9) target bundleno = 835 (0x343), region = 56  ;;  %p344_p10 = scmp.lt.s32.totalorder (!%p303_p9), %s1537_s21, 31  ;;  %v1854_v1 = vld [vmem:[%s2352_s2] sm:$0xff] (!%p303_p9)   ;;  %1676 = vmatprep.mubr.msk.bf16.mxu1 (!%p303_p9), %vm500_vm0, %v1853_v0  ;;  %1835 = vset.pattern.permute.xlu0 (!%p303_p9), %v1941_v2  ;;  %v882_v22 = vld [vmem:[%s2354_s4 + $0x8] sm:$0xf] (!%p303_p9)  ;;  %v1857_v57 = vld [vmem:[%s2353_s3 + $0x10] sm:$0xff] (!%p303_p9)  }
   0xf   : > { %1708 = vmatprep.mubr.msk.bf16.mxu0 (!%p303_p9), %vm726_vm1, %v1854_v1  ;;  %1836 = vset.pattern.permute.xlu1 (!%p303_p9), %v1941_v2  ;;  %v880_v21 = vld [vmem:[%s2354_s4] sm:$0xf] (!%p303_p9)  ;;  %v881_v23 = vld [vmem:[%s2354_s4 + $0x4] sm:$0xf] (!%p303_p9)  ;;  %v883_v24 = vld [vmem:[%s2354_s4 + $0xc] sm:$0xf] (!%p303_p9) }
  0x10   : > { %898 = vperm.xlu0 (!%p303_p9), %1835, %v880_v21   ;;  %922 = vperm.xlu1 (!%p303_p9), %1836, %v882_v22   ;;  %v884_v25 = vld [vmem:[%s2354_s4 + $0x10] sm:$0xf] (!%p303_p9)  ;;  %v885_v26 = vld [vmem:[%s2354_s4 + $0x14] sm:$0xf] (!%p303_p9)  ;;  %v886_v31 = vld [vmem:[%s2354_s4 + $0x18] sm:$0xf] (!%p303_p9) }
  0x11   : > { %v887_v32 = vld [vmem:[%s2354_s4 + $0x1c] sm:$0xf] (!%p303_p9)  ;;  %v888_v33 = vld [vmem:[%s2354_s4 + $0x20] sm:$0xf] (!%p303_p9)  ;;  %v889_v34 = vld [vmem:[%s2354_s4 + $0x24] sm:$0xf] (!%p303_p9) }
  0x12   : > { %v890_v39 = vld [vmem:[%s2354_s4 + $0x28] sm:$0xf] (!%p303_p9)  ;;  %v891_v40 = vld [vmem:[%s2354_s4 + $0x2c] sm:$0xf] (!%p303_p9)  ;;  %v892_v41 = vld [vmem:[%s2354_s4 + $0x30] sm:$0xf] (!%p303_p9) }
  0x13   : > { %v893_v42 = vld [vmem:[%s2354_s4 + $0x34] sm:$0xf] (!%p303_p9)  ;;  %v894_v47 = vld [vmem:[%s2354_s4 + $0x38] sm:$0xf] (!%p303_p9)  ;;  %v895_v48 = vld [vmem:[%s2354_s4 + $0x3c] sm:$0xf] (!%p303_p9) }
  0x14   : > { %910 = vperm.xlu0 (!%p303_p9), %1835, %v881_v23   ;;  %934 = vperm.xlu1 (!%p303_p9), %1836, %v883_v24   ;;  %v1253_v49 = vld [vmem:[%s2356_s6] sm:$0xf] (!%p303_p9)  ;;  %v1254_v50 = vld [vmem:[%s2356_s6 + $0x4] sm:$0xf] (!%p303_p9)  ;;  %v1255_v53 = vld [vmem:[%s2356_s6 + $0x8] sm:$0xf] (!%p303_p9) }
  0x15   : > { %s2367_s21 = smov (!%p344_p10, %s1537_s21), 31  ;;  %v1256_v54 = vld [vmem:[%s2356_s6 + $0xc] sm:$0xf]  ;;  %v1257_v58 = vld [vmem:[%s2356_s6 + $0x10] sm:$0xf]  ;;  %v1859_v63 = vld [vmem:[%s2353_s3 + $0x18] sm:$0xff]  }
  0x16   : > { %s1538_s26 = sshll.u32 %s2367_s21, 2  ;;  %v1856_v56 = vld [vmem:[%s2352_s2 + $0x8] sm:$0xff]   ;;  %v1858_v59 = vld [vmem:[%s2352_s2 + $0x10] sm:$0xff]   ;;  %v1259_v61 = vld [vmem:[%s2356_s6 + $0x18] sm:$0xf]  ;;  %vm1944_vm2 = vmmov 0  }
  0x17   : > { %s2058_s29 = scalar_lea.vmem %s2351_s1, %s1538_s26  ;;  %s2063_s17 = scalar_lea.vmem %s2350_s0, %s1538_s26  ;;  %v1258_v60 = vld [vmem:[%s2356_s6 + $0x14] sm:$0xf]  ;;  %v1260_v62 = vld [vmem:[%s2356_s6 + $0x1c] sm:$0xf]  ;;  %v1861_v1 = vld [vmem:[%s2353_s3 + $0x20] sm:$0xff]   ;;  %vm1396_vm3 = vcmask 523264  }
  0x18   : > { %v1837_v3 = vld [vmem:[%s2058_s29] sm:$0xff]   ;;  %v1839_v6 = vld [vmem:[%s2058_s29 + $0x8] sm:$0xff]   ;;  %v1841_v10 = vld [vmem:[%s2058_s29 + $0x10] sm:$0xff]   ;;  %946 = vperm.xlu0 %1835, %v884_v25   ;;  %958 = vperm.xlu1 %1836, %v885_v26   ;;  %s340_s14 = sand.u32 1, %s1931_s10   ;;  %s1608_s21 = sshll.u32 %s2017_s13, 6 }
  0x19   : > { %v1838_v4 = vld [vmem:[%s2063_s17] sm:$0xff]   ;;  %1776 = vmatprep.subr.msk.bf16.mxu1 %vm500_vm0, %v1837_v3  ;;  %v526_v5 = vsel %vm500_vm0, %v1837_v3, 0  ;;  %v1840_v8 = vld [vmem:[%s2063_s17 + $0x8] sm:$0xff]   ;;  %v529_v9 = vsel %vm500_vm0, %v1839_v6, 0  ;;  %v1842_v12 = vld [vmem:[%s2063_s17 + $0x10] sm:$0xff]   ;;  %v532_v13 = vsel %vm500_vm0, %v1841_v10, 0  ;;  %s2308_s24 = scalar_lea.hbm %s2359_s9, %s1608_s21 }
  0x1a   : > { %1784 = vmatprep.subr.msk.bf16.mxu0 %vm726_vm1, %v1838_v4  ;;  %1661 = vmatpush3.bf16.xpose.msra.mxu1 %v526_v5  ;;  %v752_v7 = vsel %vm726_vm1, %v1838_v4, 0  ;;  %v755_v11 = vsel %vm726_vm1, %v1840_v8, 0  ;;  %v1843_v14 = vld [vmem:[%s2058_s29 + $0x18] sm:$0xff]   ;;  %v758_v15 = vsel %vm726_vm1, %v1842_v12, 0  ;;  %v1845_v18 = vld [vmem:[%s2058_s29 + $0x20] sm:$0xff]   ;;  %v1847_v28 = vld [vmem:[%s2058_s29 + $0x28] sm:$0xff]  }
  0x1b   : > { %1693 = vmatpush3.bf16.xpose.msra.mxu0 %v752_v7  ;;  %1777 = vmatprep.subr.msk.bf16.mxu1 %vm500_vm0, %v1839_v6  ;;  %v1844_v16 = vld [vmem:[%s2063_s17 + $0x18] sm:$0xff]   ;;  %v535_v17 = vsel %vm500_vm0, %v1843_v14, 0  ;;  %v1846_v20 = vld [vmem:[%s2063_s17 + $0x20] sm:$0xff]   ;;  %v538_v27 = vsel %vm500_vm0, %v1845_v18, 0  ;;  %v1848_v30 = vld [vmem:[%s2063_s17 + $0x28] sm:$0xff]   ;;  %v541_v35 = vsel %vm500_vm0, %v1847_v28, 0 }
  0x1c   : > { %1785 = vmatprep.subr.msk.bf16.mxu0 %vm726_vm1, %v1840_v8  ;;  %v761_v19 = vsel %vm726_vm1, %v1844_v16, 0  ;;  %v764_v29 = vsel %vm726_vm1, %v1846_v20, 0  ;;  %970 = vperm.xlu0 %1835, %v886_v31   ;;  %v1849_v36 = vld [vmem:[%s2058_s29 + $0x30] sm:$0xff]   ;;  %v767_v37 = vsel %vm726_vm1, %v1848_v30, 0  ;;  %v1851_v44 = vld [vmem:[%s2058_s29 + $0x38] sm:$0xff]   ;;  %v1862_v4 = vld [vmem:[%s2352_s2 + $0x20] sm:$0xff]  }
  0x1d   : > { %982 = vperm.xlu1 %1836, %v887_v32   ;;  %v1850_v38 = vld [vmem:[%s2063_s17 + $0x30] sm:$0xff]   ;;  %v544_v43 = vsel %vm500_vm0, %v1849_v36, 0  ;;  %v1852_v46 = vld [vmem:[%s2063_s17 + $0x38] sm:$0xff]   ;;  %v547_v51 = vsel %vm500_vm0, %v1851_v44, 0  ;;  %v1390_v3 = vld [vmem:[%s2358_s8] sm:$0x7] }
  0x1e   : > { %v770_v45 = vsel %vm726_vm1, %v1850_v38, 0  ;;  %v773_v52 = vsel %vm726_vm1, %v1852_v46, 0  ;;  %v1860_v0 = vld [vmem:[%s2352_s2 + $0x18] sm:$0xff]   ;;  %v1863_v5 = vld [vmem:[%s2353_s3 + $0x28] sm:$0xff]   ;;  %v1865_v7 = vld [vmem:[%s2353_s3 + $0x30] sm:$0xff]   ;;  %s1536_s16 = sshll.u32 %s340_s14, 2 }
  0x1f   : > { %v1864_v6 = vld [vmem:[%s2352_s2 + $0x28] sm:$0xff]   ;;  %v1866_v8 = vld [vmem:[%s2352_s2 + $0x30] sm:$0xff]   ;;  %s342_s22 = scalar_lea.vmem [#allocation2], %s1536_s16  ;;  %s1448_s25 = scalar_lea.sflag [#allocation3], %s340_s14 }
  0x20   : > { %994 = vperm.xlu0 %1835, %v888_v33   ;;  %s1461_s29 = sshll.u32 %s342_s22, 4  ;;  %s1945_s13 = smov [#allocation2]   ;;  %s2310_s29 = int_to_ptr.vmem [resolvable:$true] %s1461_s29 }
  0x21   : > { %1006 = vperm.xlu1 %1836, %v889_v34   ;;  %s1877_s26 = scalar_lea.vmem %s2310_s29, 64  ;;  %s1881_s27 = sshll.u32 %s1945_s13, 4  ;;  %s1882_s27 = int_to_ptr.vmem [resolvable:$false] %s1881_s27 }
  0x22   : > { %1663 = vmatpush3.bf16.xpose.msra.mxu1 %v529_v9  ;;  %v1867_v9 = vld [vmem:[%s2353_s3 + $0x38] sm:$0xff]   ;;  %p1878_p11 = scmp.ne.s32.totalorder %s2310_s29, %s1877_s26  ;;  %s1883_s28 = scalar_lea.vmem %s1882_s27, 128 }
  0x23   : > { %1695 = vmatpush3.bf16.xpose.msra.mxu0 %v755_v11  ;;  %1778 = vmatprep.subr.msk.bf16.mxu1 %vm500_vm0, %v1841_v10  ;;  %v1868_v10 = vld [vmem:[%s2352_s2 + $0x38] sm:$0xff]   ;;  %v1869_v11 = vld [vmem:[%s2355_s5] sm:$0xff]   ;;  %p1884_p0 = scmp.lt.s32.totalorder %s2310_s29, %s1882_s27  ;;  %p1885_p1 = scmp.lt.s32.totalorder %s1883_s28, %s1877_s26 }
  0x24   : > { %1786 = vmatprep.subr.msk.bf16.mxu0 %vm726_vm1, %v1842_v12  ;;  %1018 = vperm.xlu0 %1835, %v890_v39   ;;  %p1879_p12 = pnand %p1878_p11, %p2034_p5 }
  0x25   : > { %1030 = vperm.xlu1 %1836, %v891_v40   ;;  %p1886_p2 = por %p1885_p1, %p1884_p0 }
  0x26   : > { %p1880_p13 = pneg %p1879_p12 }
  0x28   : > { %1042 = vperm.xlu0 %1835, %v892_v41   ;;  %p1887_p3 = pnand %p1886_p2, %p1880_p13 }
  0x29   : > { %1054 = vperm.xlu1 %1836, %v893_v42  }
  0x2a   : > { %1665 = vmatpush3.bf16.xpose.msra.mxu1 %v532_v13 }
  0x2b   : > { %1697 = vmatpush3.bf16.xpose.msra.mxu0 %v758_v15  ;;  %1779 = vmatprep.subr.msk.bf16.mxu1 %vm500_vm0, %v1843_v14 }
  0x2c   : > { %1787 = vmatprep.subr.msk.bf16.mxu0 %vm726_vm1, %v1844_v16  ;;  %1066 = vperm.xlu0 %1835, %v894_v47  }
  0x2d   : > { %1078 = vperm.xlu1 %1836, %v895_v48  }
  0x30   : > { %1263 = vperm.xlu0 %1835, %v1253_v49  }
  0x31   : > { %1275 = vperm.xlu1 %1836, %v1254_v50  }
  0x32   : > { %1667 = vmatpush3.bf16.xpose.msra.mxu1 %v535_v17 }
  0x33   : > { %1699 = vmatpush3.bf16.xpose.msra.mxu0 %v761_v19  ;;  %1780 = vmatprep.subr.msk.bf16.mxu1 %vm500_vm0, %v1845_v18  ;;  %v1942_v18 = vmov 839922192  }
  0x34   : > { %1788 = vmatprep.subr.msk.bf16.mxu0 %vm726_vm1, %v1846_v20  ;;  %1287 = vperm.xlu0 %1835, %v1255_v53   ;;  %v902_v19 = vunpack.c.l.s4 %v1942_v18  ;;  %v904_v20 = vlaneseq }
  0x35   : > { %1299 = vperm.xlu1 %1836, %v1256_v54  }
  0x36   : > { %v903_v23 = vunpack.c.0.s8 %v902_v19  ;;  %v905_v24 = vshrl.u32 %v904_v20, 7 }
  0x38   : > { %1311 = vperm.xlu0 %1835, %v1257_v58   ;;  %v2247_v25 = vsub.s32 %v903_v23, %v905_v24 }
  0x39   : > { %1323 = vperm.xlu1 %1836, %v1258_v60  }
  0x3a   : > { %1669 = vmatpush3.bf16.xpose.msra.mxu1 %v538_v27 }
  0x3b   : > { %1701 = vmatpush3.bf16.xpose.msra.mxu0 %v764_v29  ;;  %1781 = vmatprep.subr.msk.bf16.mxu1 %vm500_vm0, %v1847_v28 }
  0x3c   : > { %1789 = vmatprep.subr.msk.bf16.mxu0 %vm726_vm1, %v1848_v30  ;;  %1335 = vperm.xlu0 %1835, %v1259_v61  }
  0x3d   : > { %1347 = vperm.xlu1 %1836, %v1260_v62  }
  0x40   : > { %1393 = vperm.xlu0 %1835, %v1390_v3  }
  0x42   : > { %1671 = vmatpush3.bf16.xpose.msra.mxu1 %v541_v35 }
  0x43   : > { %1703 = vmatpush3.bf16.xpose.msra.mxu0 %v767_v37  ;;  %1782 = vmatprep.subr.msk.bf16.mxu1 %vm500_vm0, %v1849_v36 }
  0x44   : > { %1790 = vmatprep.subr.msk.bf16.mxu0 %vm726_vm1, %v1850_v38 }
  0x4a   : > { %1673 = vmatpush3.bf16.xpose.msra.mxu1 %v544_v43 }
  0x4b   : > { %1705 = vmatpush3.bf16.xpose.msra.mxu0 %v770_v45  ;;  %1783 = vmatprep.subr.msk.bf16.mxu1 %vm500_vm0, %v1851_v44 }
  0x4c   : > { %1791 = vmatprep.subr.msk.bf16.mxu0 %vm726_vm1, %v1852_v46 }
  0x52   : > { %1675 = vmatpush3.bf16.xpose.msra.mxu1 %v547_v51 }
  0x53   : > { %1707 = vmatpush3.bf16.xpose.msra.mxu0 %v773_v52 }
  0x59   : > { %1677 = vmatmul.mubr.msk.bf16.vlgmr.msra.gmra.mrb[0].mxu1 %vm500_vm0, %v1855_v55 }
  0x5a   : > { %1709 = vmatmul.mubr.msk.bf16.vlgmr.msra.gmra.mrb[0].mxu0 %vm726_vm1, %v1856_v56  ;;  %1680 = vmatprep.mubr.msk.bf16.mxu1 %vm500_vm0, %v1857_v57 }
  0x5b   : > { %1712 = vmatprep.mubr.msk.bf16.mxu0 %vm726_vm1, %v1858_v59 }
  0x61   : > { %1681 = vmatmul.mubr.msk.bf16.gmra.mrb[4].mxu1 %vm500_vm0, %v1859_v63 }
  0x62   : > { %1713 = vmatmul.mubr.msk.bf16.gmra.mrb[4].mxu0 %vm726_vm1, %v1860_v0  ;;  %1684 = vmatprep.mubr.msk.bf16.mxu1 %vm500_vm0, %v1861_v1 }
  0x63   : > { %1716 = vmatprep.mubr.msk.bf16.mxu0 %vm726_vm1, %v1862_v4 }
  0x69   : > { %1685 = vmatmul.mubr.msk.bf16.gmra.mrb[8].mxu1 %vm500_vm0, %v1863_v5 }
  0x6a   : > { %1717 = vmatmul.mubr.msk.bf16.gmra.mrb[8].mxu0 %vm726_vm1, %v1864_v6  ;;  %1688 = vmatprep.mubr.msk.bf16.mxu1 %vm500_vm0, %v1865_v7 }
  0x6b   : > { %1720 = vmatprep.mubr.msk.bf16.mxu0 %vm726_vm1, %v1866_v8 }
  0x71   : > { %1689 = vmatmul.mubr.msk.bf16.gmra.mrb[12].mxu1 %vm500_vm0, %v1867_v9 }
  0x72   : > { %1721 = vmatmul.mubr.msk.bf16.gmra.mrb[12].mxu0 %vm726_vm1, %v1868_v10 }
  0x73   : > { %1740 = vmatprep.mubr.bf16.mxu0 %v1869_v11 }
  0x8f   : > { %v899_v12 = vpop.permute.xlu0 %898  ;;  %v923_v13 = vpop.permute.xlu1 %922 }
  0x90   : > { %v931_v29 = vrot.slane %v923_v13, %v2247_v25  ;;  %v907_v36 = vrot.slane %v899_v12, %v2247_v25 }
  0x93   : > { %v911_v14 = vpop.permute.xlu0 %910  ;;  %v935_v15 = vpop.permute.xlu1 %934 }
  0x94   : > { %v943_v30 = vrot.slane %v935_v15, %v2247_v25  ;;  %v919_v37 = vrot.slane %v911_v14, %v2247_v25 }
  0x96   : > { %v1590_v43 = vcombine.low %v931_v29, %v943_v30  ;;  %v1589_v46 = vcombine.low %v907_v36, %v919_v37 }
  0x97   : > { %v947_v16 = vpop.permute.xlu0 %946  ;;  %v959_v17 = vpop.permute.xlu1 %958 }
  0x98   : > { %v955_v55 = vrot.slane %v947_v16, %v2247_v25  ;;  %v967_v56 = vrot.slane %v959_v17, %v2247_v25 }
  0x9a   : > { %v1591_v8 = vcombine.low %v955_v55, %v967_v56 }
  0x9b   : > { %v971_v21 = vpop.permute.xlu0 %970 }
  0x9c   : > { %v983_v22 = vpop.permute.xlu1 %982  ;;  %v979_v60 = vrot.slane %v971_v21, %v2247_v25 }
  0x9d   : > { %v991_v61 = vrot.slane %v983_v22, %v2247_v25 }
  0x9f   : > { %v2249_v26 = vpop.permute.xlu0 %994  ;;  %v1592_v9 = vcombine.low %v979_v60, %v991_v61 }
  0xa0   : > { %v2251_v27 = vpop.permute.xlu1 %1006  ;;  %v1003_v18 = vrot.slane %v2249_v26, %v2247_v25 }
  0xa1   : > { %v1015_v19 = vrot.slane %v2251_v27, %v2247_v25 }
  0xa3   : > { %v1019_v47 = vpop.permute.xlu0 %1018 }
  0xa4   : > { %v1031_v49 = vpop.permute.xlu1 %1030  ;;  %v1027_v23 = vrot.slane %v1019_v47, %v2247_v25 }
  0xa5   : > { %v1039_v24 = vrot.slane %v1031_v49, %v2247_v25 }
  0xa7   : > { %v1043_v10 = vpop.permute.xlu0 %1042  ;;  %v1594_v36 = vcombine.low %v1027_v23, %v1039_v24 }
  0xa8   : > { %v1055_v12 = vpop.permute.xlu1 %1054 }
  0xab   : > { %v1067_v37 = vpop.permute.xlu0 %1066 }
 0x12c   : > { %v1678_v28 = vpop.f32.mrb[0].mxu1 }
 0x12d   : > { %v1710_v31 = vpop.f32.mrb[0].mxu0  ;;  %v583_v32 = vpop.f32.mrb[1].mxu1 }
 0x12e   : > { %v818_v33 = vadd.f32 %v1710_v31, %v1678_v28  ;;  %v809_v34 = vpop.f32.mrb[1].mxu0  ;;  %v1679_v35 = vpop.f32.mrb[2].mxu1 }
 0x12f   : > { %v810_v38 = vadd.f32 %v809_v34, %v583_v32  ;;  %v1711_v39 = vpop.f32.mrb[2].mxu0  ;;  %v586_v40 = vpop.f32.mrb[3].mxu1 }
 0x130   : > { %v821_v41 = vadd.f32 %v1711_v39, %v1679_v35  ;;  %v812_v42 = vpop.f32.mrb[3].mxu0  ;;  %v1593_v35 = vcombine.low %v1003_v18, %v1015_v19  ;;  %v1079_v39 = vpop.permute.xlu1 %1078 }
 0x131   : > { %v813_v44 = vadd.f32 %v812_v42, %v586_v40 }
 0x132   : > { %v873_v45 = vpack.c.bf16 %v821_v41, %v818_v33 }
 0x133   : > { %v872_v48 = vpack.c.bf16 %v813_v44, %v810_v38 }
 0x134   : > { %v1682_v50 = vpop.f32.mrb[4].mxu1  ;;  %v1137_v51 = vadd.bf16 %v1590_v43, %v873_v45  ;;  %v1051_v45 = vrot.slane %v1043_v10, %v2247_v25  ;;  %v1264_v10 = vpop.permute.xlu0 %1263 }
 0x135   : > { %v1136_v52 = vadd.bf16 %v1589_v46, %v872_v48  ;;  %v1714_v53 = vpop.f32.mrb[4].mxu0  ;;  %v599_v54 = vpop.f32.mrb[5].mxu1  ;;  %v1063_v46 = vrot.slane %v1055_v12, %v2247_v25 }
 0x136   : > { %v834_v57 = vadd.f32 %v1714_v53, %v1682_v50  ;;  %v825_v58 = vpop.f32.mrb[5].mxu0  ;;  %v1683_v59 = vpop.f32.mrb[6].mxu1  ;;  %v1145_v6 = vmax.bf16 %v1941_v2, %v1137_v51  ;;  %v1075_v50 = vrot.slane %v1067_v37, %v2247_v25  ;;  %v1087_v51 = vrot.slane %v1079_v39, %v2247_v25 }
 0x137   : > { %v826_v62 = vadd.f32 %v825_v58, %v599_v54  ;;  %v1715_v63 = vpop.f32.mrb[6].mxu0  ;;  %v602_v0 = vpop.f32.mrb[7].mxu1  ;;  %v1144_v1 = vmax.bf16 %v1941_v2, %v1136_v52  ;;  %v1595_v61 = vcombine.low %v1051_v45, %v1063_v46 }
 0x138   : > { %v837_v3 = vadd.f32 %v1715_v63, %v1683_v59  ;;  %v828_v4 = vpop.f32.mrb[7].mxu0  ;;  %v1288_v12 = vpop.permute.xlu0 %1287 }
 0x139   : > { %v829_v5 = vadd.f32 %v828_v4, %v602_v0  ;;  %1724 = vmatprep.subr.bf16.mxu0 %v1144_v1 }
 0x13a   : > { %v875_v7 = vpack.c.bf16 %v837_v3, %v834_v57  ;;  %1725 = vmatpush3.bf16.msra.mxu0 %v1144_v1 }
 0x13b   : > { %v874_v11 = vpack.c.bf16 %v829_v5, %v826_v62  ;;  %1726 = vmatprep.subr.bf16.mxu0 %v1145_v6  ;;  %v1596_v62 = vcombine.low %v1075_v50, %v1087_v51  ;;  %v1870_v5 = vld [vmem:[%s2355_s5 + $0x8] sm:$0xff]  }
 0x13c   : > { %v1686_v13 = vpop.f32.mrb[8].mxu1  ;;  %v1139_v14 = vadd.bf16 %v1592_v9, %v875_v7  ;;  %v1872_v7 = vld [vmem:[%s2355_s5 + $0x18] sm:$0xff]   ;;  %v1276_v9 = vpop.permute.xlu1 %1275 }
 0x13d   : > { %v1138_v15 = vadd.bf16 %v1591_v8, %v874_v11  ;;  %v1718_v16 = vpop.f32.mrb[8].mxu0  ;;  %v615_v17 = vpop.f32.mrb[9].mxu1  ;;  %v1943_v8 = vmov 0.0  }
 0x13e   : > { %v850_v20 = vadd.f32 %v1718_v16, %v1686_v13  ;;  %v841_v21 = vpop.f32.mrb[9].mxu0  ;;  %1727 = vmatpush3.bf16.msra.mxu0 %v1145_v6  ;;  %v1687_v22 = vpop.f32.mrb[10].mxu1  ;;  %v1147_v26 = vmax.bf16 %v1941_v2, %v1139_v14  ;;  %v1871_v6 = vld [vmem:[%s2355_s5 + $0x10] sm:$0xff]   ;;  %1748 = vmatprep.subr.bf16.mxu1 %v1943_v8  ;;  %v1296_v14 = vrot.slane %v1288_v12, %v2247_v25 }
 0x13f   : > { %v842_v28 = vadd.f32 %v841_v21, %v615_v17  ;;  %v1719_v29 = vpop.f32.mrb[10].mxu0  ;;  %v618_v30 = vpop.f32.mrb[11].mxu1  ;;  %v1146_v31 = vmax.bf16 %v1941_v2, %v1138_v15  ;;  %1756 = vmatprep.mubr.msk.bf16.mxu1 %vm1944_vm2, %v1943_v8  ;;  %v1272_v16 = vrot.slane %v1264_v10, %v2247_v25  ;;  %v1284_v17 = vrot.slane %v1276_v9, %v2247_v25 }
 0x140   : > { %v853_v32 = vadd.f32 %v1719_v29, %v1687_v22  ;;  %v844_v33 = vpop.f32.mrb[11].mxu0  ;;  %v1300_v11 = vpop.permute.xlu1 %1299 }
 0x141   : > { %v845_v34 = vadd.f32 %v844_v33, %v618_v30  ;;  %1728 = vmatprep.subr.bf16.mxu0 %v1146_v31  ;;  %v1308_v15 = vrot.slane %v1300_v11, %v2247_v25  ;;  %v1312_v18 = vpop.permute.xlu0 %1311 }
 0x142   : > { %v877_v27 = vpack.c.bf16 %v853_v32, %v850_v20  ;;  %1729 = vmatpush3.bf16.msra.mxu0 %v1146_v31 }
 0x143   : > { %v876_v38 = vpack.c.bf16 %v845_v34, %v842_v28  ;;  %1730 = vmatprep.subr.bf16.mxu0 %v1147_v26  ;;  %v1602_v22 = vcombine.low %v1296_v14, %v1308_v15  ;;  %v1601_v28 = vcombine.low %v1272_v16, %v1284_v17 }
 0x144   : > { %v1690_v40 = vpop.f32.mrb[12].mxu1  ;;  %v1141_v41 = vadd.bf16 %v1594_v36, %v877_v27  ;;  %v1324_v13 = vpop.permute.xlu1 %1323  ;;  %v1320_v27 = vrot.slane %v1312_v18, %v2247_v25 }
 0x145   : > { %v1140_v42 = vadd.bf16 %v1593_v35, %v876_v38  ;;  %v1722_v43 = vpop.f32.mrb[12].mxu0  ;;  %v631_v44 = vpop.f32.mrb[13].mxu1  ;;  %v1332_v35 = vrot.slane %v1324_v13, %v2247_v25 }
 0x146   : > { %v866_v47 = vadd.f32 %v1722_v43, %v1690_v40  ;;  %v857_v48 = vpop.f32.mrb[13].mxu0  ;;  %1731 = vmatpush3.bf16.msra.mxu0 %v1147_v26  ;;  %v1691_v49 = vpop.f32.mrb[14].mxu1  ;;  %v1149_v59 = vmax.bf16 %v1941_v2, %v1141_v41 }
 0x147   : > { %v858_v52 = vadd.f32 %v857_v48, %v631_v44  ;;  %v1723_v53 = vpop.f32.mrb[14].mxu0  ;;  %v634_v54 = vpop.f32.mrb[15].mxu1  ;;  %v1148_v55 = vmax.bf16 %v1941_v2, %v1140_v42  ;;  %v1603_v43 = vcombine.low %v1320_v27, %v1332_v35 }
 0x148   : > { %v869_v56 = vadd.f32 %v1723_v53, %v1691_v49  ;;  %v860_v57 = vpop.f32.mrb[15].mxu0  ;;  %v1348_v29 = vpop.permute.xlu1 %1347  ;;  %v1389_v49 = vld [vmem:[%s2357_s7] sm:$0x3] }
 0x149   : > { %v861_v58 = vadd.f32 %v860_v57, %v634_v54  ;;  %1732 = vmatprep.subr.bf16.mxu0 %v1148_v55  ;;  %v1336_v32 = vpop.permute.xlu0 %1335  ;;  %v1356_v26 = vrot.slane %v1348_v29, %v2247_v25 }
 0x14a   : > { %v879_v60 = vpack.c.bf16 %v869_v56, %v866_v47  ;;  %1733 = vmatpush3.bf16.msra.mxu0 %v1148_v55  ;;  %v1344_v34 = vrot.slane %v1336_v32, %v2247_v25 }
 0x14b   : > { %v878_v63 = vpack.c.bf16 %v861_v58, %v858_v52  ;;  %1734 = vmatprep.subr.bf16.mxu0 %v1149_v59 }
 0x14c   : > { %v1143_v0 = vadd.bf16 %v1596_v62, %v879_v60  ;;  %v1604_v40 = vcombine.low %v1344_v34, %v1356_v26 }
 0x14d   : > { %v1142_v1 = vadd.bf16 %v1595_v61, %v878_v63  ;;  %v1394_v50 = vpop.permute.xlu0 %1393 }
 0x14e   : > { %1735 = vmatpush3.bf16.msra.mxu0 %v1149_v59  ;;  %v1151_v4 = vmax.bf16 %v1941_v2, %v1143_v0 }
 0x14f   : > { %v1150_v3 = vmax.bf16 %v1941_v2, %v1142_v1 }
 0x151   : > { %1736 = vmatprep.subr.bf16.mxu0 %v1150_v3 }
 0x152   : > { %1737 = vmatpush3.bf16.msra.mxu0 %v1150_v3 }
 0x153   : > { %1738 = vmatprep.subr.bf16.mxu0 %v1151_v4 }
 0x156   : > { %1739 = vmatpush3.bf16.msra.mxu0 %v1151_v4 }
 0x159   : > { %1741 = vmatmul.mubr.bf16.vlgmr.msra.gmra.mrb[16].mxu0 %v1870_v5 }
 0x15a   : > { %1744 = vmatprep.mubr.bf16.mxu0 %v1871_v6 }
 0x161   : > { %1745 = vmatmul.mubr.bf16.gmra.mrb[20].mxu0 %v1872_v7 }
 0x22c   : > { %v1742_v19 = vpop.f32.mrb[16].mxu0 }
 0x22d   : > { %v1218_v20 = vpop.f32.mrb[17].mxu0 }
 0x22e   : > { %v1743_v21 = vpop.f32.mrb[18].mxu0 }
 0x22f   : > { %v1250_v23 = vpack.c.bf16 %v1743_v21, %v1742_v19  ;;  %v1221_v24 = vpop.f32.mrb[19].mxu0 }
 0x230   : > { %v1249_v30 = vpack.c.bf16 %v1221_v24, %v1218_v20 }
 0x231   : > { %v1382_v31 = vadd.bf16 %v1602_v22, %v1250_v23 }
 0x232   : > { %v1381_v33 = vadd.bf16 %v1601_v28, %v1249_v30 }
 0x233   : > { %v1386_v44 = vmax.bf16 %v1941_v2, %v1382_v31 }
 0x234   : > { %v1385_v36 = vmax.bf16 %v1941_v2, %v1381_v33  ;;  %v1746_v37 = vpop.f32.mrb[20].mxu0 }
 0x235   : > { %v1234_v38 = vpop.f32.mrb[21].mxu0 }
 0x236   : > { %v1747_v39 = vpop.f32.mrb[22].mxu0  ;;  %1749 = vmatpush3.bf16.msra.mxu1 %v1385_v36 }
 0x237   : > { %v1252_v41 = vpack.c.bf16 %v1747_v39, %v1746_v37  ;;  %v1237_v42 = vpop.f32.mrb[23].mxu0  ;;  %1750 = vmatprep.subr.bf16.mxu1 %v1943_v8 }
 0x238   : > { %v1251_v45 = vpack.c.bf16 %v1237_v42, %v1234_v38 }
 0x239   : > { %v1384_v46 = vadd.bf16 %v1604_v40, %v1252_v41 }
 0x23a   : > { %v1383_v47 = vadd.bf16 %v1603_v43, %v1251_v45  ;;  %1751 = vmatpush3.bf16.msra.mxu1 %v1386_v44 }
 0x23b   : > { %1752 = vmatprep.subr.bf16.mxu1 %v1943_v8  ;;  %v1388_v48 = vmax.bf16 %v1941_v2, %v1384_v46 }
 0x23c   : > { %v1387_v25 = vmax.bf16 %v1941_v2, %v1383_v47 }
 0x23e   : > { %1753 = vmatpush3.bf16.msra.mxu1 %v1387_v25 }
 0x23f   : > { %1754 = vmatprep.subr.bf16.mxu1 %v1943_v8 }
 0x242   : > { %1755 = vmatpush3.bf16.msra.mxu1 %v1388_v48 }
 0x245   : > { %1757 = vmatmul.mubr.msk.bf16.vlgmr.msra.gmra.mrb[16].mxu1 %vm1396_vm3, %v1389_v49 }
 0x318   : > { %v1434_v51 = vpop.f32.mrb[16].mxu1 }
 0x319   : > { %v1435_v52 = vadd.f32 %v1434_v51, %v1394_v50  ;;  %v1758_v53 = vpop.f32.mrb[17].mxu1 }
 0x31a   : > { %v1437_v54 = vpop.f32.mrb[18].mxu1 }
 0x31b   : > { %v1606_v55 = vmul.f32 -1.442695, %v1435_v52  ;;  %v1759_v56 = vpop.f32.mrb[19].mxu1 }
 0x31d   : > { %1873 = vpow2.f32 %v1606_v55 }
 0x327   : > { %v1874_v57 = vpop.eup %1873 }
 0x328   : > { %v1443_v2 = vadd.f32 1.0, %v1874_v57 }
 0x32a   : > { %1875 = vrcp.f32 %v1443_v2 }
 0x334   : > { %v1876_v58 = vpop.eup %1875 }
 0x335   : > { %1446 = vst [vmem:[%s342_s22] sm:$0x7] %v1876_v58 }
 0x336   : > { %1890 = shalt.err (!%p1887_p3)
}
 0x337   : > { %s1891_s14 = scalar_lea.hbm %s2308_s24, 64  ;;  %s1895_s22 = scalar_lea.hbm %s2359_s9, 128 }
 0x338   : > { %p1892_p4 = scmp.ne.s32.totalorder %s2308_s24, %s1891_s14  ;;  %p1896_p9 = scmp.lt.u32.totalorder %s2308_s24, %s2359_s9 }
 0x339   : > { %p1897_p10 = scmp.lt.u32.totalorder %s1895_s22, %s1891_s14  ;;  %p1899_p12 = scmp.lt.u32.totalorder %s1891_s14, %s2308_s24 }
 0x33a   : > { %p1893_p7 = pnand %p1892_p4, %p2034_p5 }
 0x33b   : > { %p1898_p11 = por %p1897_p10, %p1896_p9 }
 0x33c   : > { %p1894_p8 = pneg %p1893_p7 }
 0x33d   : > { %p1900_p13 = por %p1899_p12, %p1898_p11 }
 0x33f   : > { %p1901_p0 = pnand %p1900_p13, %p1894_p8 }
 0x341   : > { %1904 = shalt.err (!%p1901_p0)
}
 0x342   : > { %1792 = dma.vmem_to_hbm [thread:$0]  (%p2034_p5), %s2310_s29, 64, %s2308_s24, %s1448_s25  }
 0x343 PF: > { %p1798_p1 = scmp.ge.s32.totalorder %s1939_s12, 2  ;;  %s1473_s26 = sand.u32 1, %s1927_s30  }
 0x344   : > { %s1474_s13 = scalar_lea.sflag [#allocation3], %s1473_s26 }
 0x345   : > { %p1795_p2 = pnand %p1798_p1, %p2038_p6 }
 0x347   : > { %1922 = dma.done.wait (!%p1795_p2), %s1474_s13, 64  }
 0x348   : > { %1924 = vsyncadd (!%p1795_p2), %s1474_s13, 4294967232  ;;  %p19_p3 = scmp.ge.s32.totalorder %s2021_s15, 4   ;;  %s2362_s30 = smov %s1931_s10 }
 0x349   : > { %s2363_s10 = smov %s1935_s11  ;;  %s2364_s11 = smov %s2032_s18 }
 0x34a   : > { %s2365_s12 = smov %s2021_s15  ;;  %21 = sbr.rel (!%p19_p3) target bundleno = 3 (0x3), region = 94 }
 0x351   :  { %1479 = vsyncpa [#allocation3], 1 }
 0x352   :  { %1481 = vsyncpa [#allocation3 + $0x1], 1 }

</bundles_post_ra>
